<compile_context>
chip_gen: v7x
topology: tpu7x:2x2x1
jax: 0.10.0
libtpu: 0.0.40
codegen_flags: <defaults>
</compile_context>

<pallas_src>
import functools

import jax
import jax.numpy as jnp
from jax import lax
from jax.experimental import pallas as pl
from jax.experimental.pallas import tpu as pltpu


def _wsreadout_kernel_single(seq_ref, query_ref, out_ref):
    """Single node-pass kernel: the whole (TB, N, D) slab is resident in VMEM."""
    seq = seq_ref[...].astype(jnp.float32)                    # (TB, N, D)
    q = query_ref[...].astype(jnp.float32)                    # (TB, 1, D)

    # sim[b, n] = <seq[b, n, :], query[b, :]>  (VPU mul + lane reduce; free filler
    # for this memory-bound kernel).
    sim = jnp.sum(seq * q, axis=-1, keepdims=True)            # (TB, N, 1)

    # Softmax over nodes with the normalization fused into one final scale:
    #   acc = sum_n exp(sim_n - m) * seq_n ; out = acc / sum_n exp(sim_n - m)
    # -> avoids materializing normalized weights / a second pass over seq.
    m = jnp.max(sim, axis=1, keepdims=True)                   # (TB, 1, 1)
    e = jnp.exp(sim - m)                                       # (TB, N, 1)
    acc = jnp.sum(seq * e, axis=1, keepdims=True)              # (TB, 1, D)
    denom = jnp.sum(e, axis=1, keepdims=True)                  # (TB, 1, 1)
    out = acc * pl.reciprocal(denom)        # exact reciprocal keeps 1e-5 tolerance
    out_ref[...] = out.astype(out_ref.dtype)


def _wsreadout_kernel_online(seq_ref, query_ref, out_ref, m_ref, l_ref, acc_ref,
                             *, n_nodes, tn):
    """Node-tiled kernel: online softmax over the node axis (grid axis 1)."""
    k = pl.program_id(1)

    @pl.when(k == 0)
    def _():
        m_ref[...] = jnp.full_like(m_ref, -jnp.inf)
        l_ref[...] = jnp.zeros_like(l_ref)
        acc_ref[...] = jnp.zeros_like(acc_ref)

    seq = seq_ref[...].astype(jnp.float32)                    # (TB, TN, D)
    q = query_ref[...].astype(jnp.float32)                    # (TB, 1, D)

    sim = jnp.sum(seq * q, axis=-1, keepdims=True)            # (TB, TN, 1)

    if n_nodes % tn != 0:
        # Ragged last node tile: mask pad rows out of the softmax AND zero the
        # (undefined) padded seq rows so 0-weight * garbage cannot produce NaNs.
        node_ids = k * tn + lax.broadcasted_iota(jnp.int32, sim.shape, 1)
        valid = node_ids < n_nodes                             # (TB, TN, 1)
        seq = jnp.where(valid, seq, 0.0)
        sim = jnp.where(valid, sim, -jnp.inf)

    m_prev = m_ref[...]                                        # (TB, 1, 1)
    m_new = jnp.maximum(m_prev, jnp.max(sim, axis=1, keepdims=True))
    alpha = jnp.exp(m_prev - m_new)                            # (TB, 1, 1)
    e = jnp.exp(sim - m_new)                                   # (TB, TN, 1)

    l_ref[...] = alpha * l_ref[...] + jnp.sum(e, axis=1, keepdims=True)
    acc_ref[...] = alpha * acc_ref[...] + jnp.sum(seq * e, axis=1, keepdims=True)
    m_ref[...] = m_new

    @pl.when(k == pl.num_programs(1) - 1)
    def _():
        out = acc_ref[...] * pl.reciprocal(l_ref[...])         # exact reciprocal
        out_ref[...] = out.astype(out_ref.dtype)


def _choose_tiles(B, N, itemsize, vmem_budget_bytes=12 * 1024 * 1024):
    """Pick (tb, tn): batch-tile and node-tile sizes.

    VMEM working-set model per grid step (includes (8,128) tile padding: D = 64
    pads to 128 lanes for every row held in VMEM):
      per (batch, node) row : 2 double-buffered input rows (input dtype)
                              + ~4 f32 temporaries (seq_f32, seq*q, e, seq*e)
      per batch element     : query/out double buffers + accumulators, each a
                              padded 4 KiB (8,128) f32 tile.
    A 12 MiB budget stays inside v5e's 16 MiB default scoped limit and well
    inside v6e/v7x, while keeping MiB-scale seq tiles (HBM-roofline plateau).
    """
    row_bytes = 2 * 128 * itemsize + 4 * 128 * 4
    fixed_per_batch = 6 * 4096
    per_batch = N * row_bytes + fixed_per_batch
    if per_batch <= vmem_budget_bytes:
        cap = vmem_budget_bytes // per_batch
        if cap >= B:
            return B, N
        tb = 1
        for t in range(2, int(cap) + 1):
            if B % t == 0:
                tb = t
        return tb, N
    # One batch element's node slab does not fit: stream node tiles through the
    # online-softmax accumulator (tb = 1, tn a multiple of 8).
    tn = max(8, ((vmem_budget_bytes - fixed_per_batch) // row_bytes) // 8 * 8)
    return 1, min(tn, N)


def ws_readout(seq, query, *, tb=None, tn=None):
    """Pallas implementation of WSReadout.forward.

    seq:   (B, N, D) float (f32 or bf16); D must be 64 (the module hard-codes
           repeat(1, 1, 64)).  Math is done in f32 inside the kernel.
    query: (B, 1, D)
    returns (B, D), same dtype as seq.
    """
    B, N, D = seq.shape
    if D != 64:
        raise ValueError("WSReadout hard-codes feature dim 64 via repeat(1, 1, 64)")
    if query.shape != (B, 1, D):
        raise ValueError(f"query must have shape ({B}, 1, {D}), got {query.shape}")

    auto_tb, auto_tn = _choose_tiles(B, N, seq.dtype.itemsize)
    tb = auto_tb if tb is None else tb
    tn = auto_tn if tn is None else min(tn, N)
    if B % tb != 0:
        raise ValueError("tb must divide the batch size")
    if tn != N and tn % 8 != 0:
        raise ValueError("tn must equal N or be a multiple of 8")

    n_node_steps = pl.cdiv(N, tn)
    out_shape = jax.ShapeDtypeStruct((B, 1, D), seq.dtype)

    if n_node_steps == 1:
        # Fast path: whole node slab resident, no online-softmax scratch.
        out = pl.pallas_call(
            _wsreadout_kernel_single,
            out_shape=out_shape,
            grid=(B // tb,),
            in_specs=[
                pl.BlockSpec((tb, N, D), lambda i: (i, 0, 0)),
                pl.BlockSpec((tb, 1, D), lambda i: (i, 0, 0)),
            ],
            out_specs=pl.BlockSpec((tb, 1, D), lambda i: (i, 0, 0)),
            compiler_params=pltpu.CompilerParams(
                dimension_semantics=("parallel",),
                vmem_limit_bytes=32 * 1024 * 1024,
            ),
        )(seq, query)
    else:
        kernel = functools.partial(_wsreadout_kernel_online, n_nodes=N, tn=tn)
        out = pl.pallas_call(
            kernel,
            out_shape=out_shape,
            grid=(B // tb, n_node_steps),
            in_specs=[
                pl.BlockSpec((tb, tn, D), lambda i, k: (i, k, 0)),
                pl.BlockSpec((tb, 1, D), lambda i, k: (i, 0, 0)),
            ],
            out_specs=pl.BlockSpec((tb, 1, D), lambda i, k: (i, 0, 0)),
            scratch_shapes=[
                pltpu.VMEM((tb, 1, 1), jnp.float32),   # running max m
                pltpu.VMEM((tb, 1, 1), jnp.float32),   # running denom l
                pltpu.VMEM((tb, 1, D), jnp.float32),   # running weighted sum
            ],
            compiler_params=pltpu.CompilerParams(
                dimension_semantics=("parallel", "arbitrary"),
                vmem_limit_bytes=32 * 1024 * 1024,
            ),
        )(seq, query)
    return out.reshape(B, D)


def ws_readout_ref(seq, query):
    # Pure-JAX reference mirroring the PyTorch code exactly.
    q = jnp.transpose(query, (0, 2, 1))                 # (B, D, 1)
    sim = jnp.matmul(seq, q)                            # (B, N, 1)
    sim = jax.nn.softmax(sim, axis=1)                   # softmax over nodes
    sim = jnp.tile(sim, (1, 1, 64))                     # (B, N, 64)
    out = jnp.sum(seq * sim, axis=1)                    # (B, 64)
    return out


if __name__ == "__main__":
    # WSReadout has no learned parameters (empty __init__), so only inputs are needed.
    key = jax.random.PRNGKey(0)
    k1, k2, k3, k4 = jax.random.split(key, 4)

    # Small shapes implied by the module: batch=2, nodes=8, hidden=64.
    B, N, D = 2, 8, 64
    seq = jax.random.normal(k1, (B, N, D), dtype=jnp.float32)
    query = jax.random.normal(k2, (B, 1, D), dtype=jnp.float32)
    out = jax.block_until_ready(ws_readout(seq, query))
    ref = jax.block_until_ready(ws_readout_ref(seq, query))
    assert out.shape == (B, D)
    assert jnp.allclose(out, ref, atol=1e-5, rtol=1e-5), "mismatch vs reference"

    # Multi-step batch-tiled fast path (tb < B, grid=(4,)).
    B2, N2 = 16, 32
    seq2 = jax.random.normal(k3, (B2, N2, D), dtype=jnp.float32)
    query2 = jax.random.normal(k4, (B2, 1, D), dtype=jnp.float32)
    out2 = jax.block_until_ready(ws_readout(seq2, query2, tb=4))
    ref2 = jax.block_until_ready(ws_readout_ref(seq2, query2))
    assert out2.shape == (B2, D)
    assert jnp.allclose(out2, ref2, atol=1e-5, rtol=1e-5), "mismatch vs reference (batch-tiled)"

    # Node-tiled online-softmax path with a ragged last node tile (N % tn != 0).
    B3, N3 = 4, 20
    seq3 = jax.random.normal(jax.random.PRNGKey(3), (B3, N3, D), dtype=jnp.float32)
    query3 = jax.random.normal(jax.random.PRNGKey(4), (B3, 1, D), dtype=jnp.float32)
    out3 = jax.block_until_ready(ws_readout(seq3, query3, tb=2, tn=8))
    ref3 = jax.block_until_ready(ws_readout_ref(seq3, query3))
    assert out3.shape == (B3, D)
    assert jnp.allclose(out3, ref3, atol=1e-5, rtol=1e-5), "mismatch vs reference (node-tiled)"

    print("KERNEL_OK")
</pallas_src>

<mosaic_0001>
module attributes {stable_mosaic.version = 11 : i64} {
  func.func @_wsreadout_kernel_single(%arg0: i32, %arg1: memref<2x8x64xf32, #tpu.memory_space<vmem>>, %arg2: memref<2x1x64xf32, #tpu.memory_space<vmem>>, %arg3: memref<2x1x64xf32, #tpu.memory_space<vmem>>) attributes {dimension_semantics = [#tpu.dimension_semantics<parallel>], iteration_bounds = array<i64: 1>, scalar_prefetch = 0 : i64, scratch_operands = 0 : i64, tpu.core_type = #tpu.core_type<tc>, window_params = [{transform_indices = @transform_0, window_bounds = array<i64: 2, 8, 64>}, {transform_indices = @transform_1, window_bounds = array<i64: 2, 1, 64>}, {transform_indices = @transform_2, window_bounds = array<i64: 2, 1, 64>}]} {
    %c0 = arith.constant 0 : index
    %c0_0 = arith.constant 0 : index
    %c0_1 = arith.constant 0 : index
    %0 = vector.load %arg1[%c0, %c0_0, %c0_1] : memref<2x8x64xf32, #tpu.memory_space<vmem>>, vector<2x8x64xf32>
    %c0_2 = arith.constant 0 : index
    %c0_3 = arith.constant 0 : index
    %c0_4 = arith.constant 0 : index
    %1 = vector.load %arg2[%c0_2, %c0_3, %c0_4] : memref<2x1x64xf32, #tpu.memory_space<vmem>>, vector<2x1x64xf32>
    %2 = vector.broadcast %1 : vector<2x1x64xf32> to vector<2x8x64xf32>
    %3 = arith.mulf %0, %2 : vector<2x8x64xf32>
    %cst = arith.constant dense<0.000000e+00> : vector<2x8xf32>
    %4 = vector.multi_reduction <add>, %3, %cst [2] : vector<2x8x64xf32> to vector<2x8xf32>
    %5 = vector.shape_cast %4 : vector<2x8xf32> to vector<2x8x1xf32>
    %cst_5 = arith.constant dense<0xFF800000> : vector<2x1xf32>
    %6 = vector.multi_reduction <maximumf>, %5, %cst_5 [1] : vector<2x8x1xf32> to vector<2x1xf32>
    %7 = vector.shape_cast %6 : vector<2x1xf32> to vector<2x1x1xf32>
    %8 = vector.broadcast %7 : vector<2x1x1xf32> to vector<2x8x1xf32>
    %9 = arith.subf %5, %8 : vector<2x8x1xf32>
    %10 = math.exp %9 : vector<2x8x1xf32>
    %11 = vector.broadcast %10 : vector<2x8x1xf32> to vector<2x8x64xf32>
    %12 = arith.mulf %0, %11 : vector<2x8x64xf32>
    %cst_6 = arith.constant dense<0.000000e+00> : vector<2x64xf32>
    %13 = vector.multi_reduction <add>, %12, %cst_6 [1] : vector<2x8x64xf32> to vector<2x64xf32>
    %14 = vector.shape_cast %13 : vector<2x64xf32> to vector<2x1x64xf32>
    %cst_7 = arith.constant dense<0.000000e+00> : vector<2x1xf32>
    %15 = vector.multi_reduction <add>, %10, %cst_7 [1] : vector<2x8x1xf32> to vector<2x1xf32>
    %16 = vector.shape_cast %15 : vector<2x1xf32> to vector<2x1x1xf32>
    %17 = tpu.reciprocal %16 : vector<2x1x1xf32> -> vector<2x1x1xf32>
    %18 = vector.broadcast %17 : vector<2x1x1xf32> to vector<2x1x64xf32>
    %19 = arith.mulf %14, %18 : vector<2x1x64xf32>
    %c0_8 = arith.constant 0 : index
    %c0_9 = arith.constant 0 : index
    %c0_10 = arith.constant 0 : index
    %20 = vector.load %arg3[%c0_8, %c0_9, %c0_10] : memref<2x1x64xf32, #tpu.memory_space<vmem>>, vector<2x1x64xf32>
    tpu.vector_store %arg3[%c0_8, %c0_9, %c0_10], %19 {strides = array<i32>} : memref<2x1x64xf32, #tpu.memory_space<vmem>>, vector<2x1x64xf32>,
    return
  }
  func.func @transform_0(%arg0: i32) -> (i32, i32, i32) {
    %c0_i32 = arith.constant 0 : i32
    %c0_i32_0 = arith.constant 0 : i32
    %c0_i32_1 = arith.constant 0 : i32
    return %arg0, %c0_i32, %c0_i32_0 : i32, i32, i32
  }
  func.func @transform_1(%arg0: i32) -> (i32, i32, i32) {
    %c0_i32 = arith.constant 0 : i32
    %c0_i32_0 = arith.constant 0 : i32
    %c0_i32_1 = arith.constant 0 : i32
    return %arg0, %c0_i32, %c0_i32_0 : i32, i32, i32
  }
  func.func @transform_2(%arg0: i32) -> (i32, i32, i32) {
    %c0_i32 = arith.constant 0 : i32
    %c0_i32_0 = arith.constant 0 : i32
    %c0_i32_1 = arith.constant 0 : i32
    return %arg0, %c0_i32, %c0_i32_0 : i32, i32, i32
  }
}

</mosaic_0001>

<bundles_post_ra>
// kernel: tpu_custom_call.1
= control target key start
LH: loop header
LB: loop body
LE: loop exit
PB: predicated region body
PF: predicated region fallthrough
CT: control target
= control target key end

     0   :  { %7 = vsyncpa [#allocation3], 0  ;;  %s240_s0 = inlined_call_operand.hbm [shape: f32[2,8,64], index: 0, kind: input, shape index: {}]   ;;  %s241_s1 = inlined_call_operand.vmem [shape: f32[2,1,64], index: 1, kind: input, shape index: {}]   ;;  %s242_s2 = inlined_call_operand.hbm [shape: f32[2,1,64], index: 2, kind: output, shape index: {}]  }
   0x1   :  { %8 = vsyncpa [#allocation4], 0  ;;  %s185_s9 = smov [#allocation2]   ;;  %s137_s13 = scalar_lea.hbm %s240_s0, 256 }
   0x2   :  { %s14_s10 = sshll.u32 %s185_s9, 4  ;;  %p138_p0 = scmp.ne.s32.totalorder %s240_s0, %s137_s13  ;;  %s15_s10 = int_to_ptr.vmem [resolvable:$true] %s14_s10 }
   0x3   :  { %p141_p1 = scmp.lt.u32.totalorder %s137_s13, %s240_s0 }
   0x5   :  { %p143_p2 = pnand %p141_p1, %p138_p0 }
   0x7   :  { %146 = shalt.err (!%p143_p2)
}
   0x8   :  { %s147_s18 = scalar_lea.vmem %s15_s10, 256  ;;  %p152_p4 = scmp.lt.s32.totalorder %s15_s10, %s15_s10 }
   0x9   :  { %p148_p3 = scmp.ne.s32.totalorder %s15_s10, %s147_s18  ;;  %p153_p5 = scmp.lt.s32.totalorder %s147_s18, %s147_s18 }
   0xb   :  { %p154_p6 = por %p153_p5, %p152_p4 }
   0xd   :  { %p155_p7 = pnand %p154_p6, %p148_p3 }
   0xf   :  { %158 = shalt.err (!%p155_p7)
}
  0x10   :  { %s186_s19 = smov 128   ;;  %s187_s20 = smov 8  }
  0x11   :  { %20 = dma.hbm_to_vmem [thread:$0]  %s240_s0, 256, %s15_s10, [#allocation3], %s186_s19, %s186_s19, %s187_s20  }
  0x12   :  { %181 = dma.done.wait [#allocation3], 256  }
  0x13   :  { %182 = vsyncadd [#allocation3], 4294967040  ;;  %v26_v0 = vld [vmem:[#allocation2] sm:$0xff]  ;;  %vm44_vm0 = vcmask 523264   ;;  %v27_v2 = vld [vmem:[#allocation2 + $0x8] sm:$0xff]  ;;  %vm101_vm1 = vcmask 516096  }
  0x14   :  { %v121_v1 = vld [vmem:[%s241_s1] ss:$0 sm:$0xff]  ;;  %v122_v4 = vld [vmem:[%s241_s1 + $0x1] ss:$0 sm:$0xff]  ;;  %s188_s0 = smov [#allocation5]  }
  0x15   :  { %v42_v3 = vmul.f32 %v121_v1, %v26_v0  ;;  %v43_v5 = vmul.f32 %v122_v4, %v27_v2  ;;  %s109_s1 = sshll.u32 %s188_s0, 4  ;;  %s110_s1 = int_to_ptr.vmem [resolvable:$true] %s109_s1 }
  0x16   :  { %s159_s27 = scalar_lea.vmem %s110_s1, 32  ;;  %p164_p9 = scmp.lt.s32.totalorder %s110_s1, %s110_s1 }
  0x17   :  { %v45_v6 = vsel %vm44_vm0, %v42_v3, 0.0  ;;  %v48_v7 = vsel %vm44_vm0, %v43_v5, 0.0  ;;  %p160_p8 = scmp.ne.s32.totalorder %s110_s1, %s159_s27  ;;  %p165_p10 = scmp.lt.s32.totalorder %s159_s27, %s159_s27 }
  0x18   :  { %46 = vadd.xlane.f32.xlu0 %v45_v6 }
  0x19   :  { %p166_p11 = por %p165_p10, %p164_p9 }
  0x1b   :  { %p167_p12 = pnand %p166_p11, %p160_p8 }
  0x1c   :  { %49 = vadd.xlane.f32.xlu0 %v48_v7 }
  0xa5   :  { %v47_v8 = vpop.xlane.xlu0 %46 }
  0xa6   :  { %v51_v9 = vrot.slane %v47_v8, 4 }
  0xa8   :  { %v52_v10 = vmax.f32 %v47_v8, %v51_v9 }
  0xa9   :  { %v50_v11 = vpop.xlane.xlu0 %49 }
  0xaa   :  { %v53_v12 = vrot.slane %v52_v10, 2  ;;  %v57_v13 = vrot.slane %v50_v11, 4 }
  0xac   :  { %v54_v14 = vmax.f32 %v52_v10, %v53_v12  ;;  %v58_v15 = vmax.f32 %v50_v11, %v57_v13 }
  0xae   :  { %v55_v16 = vrot.slane %v54_v14, 1  ;;  %v59_v17 = vrot.slane %v58_v15, 2 }
  0xb0   :  { %v56_v18 = vmax.f32 %v54_v14, %v55_v16  ;;  %v60_v19 = vmax.f32 %v58_v15, %v59_v17 }
  0xb2   :  { %v63_v20 = vsub.f32 %v47_v8, %v56_v18  ;;  %v61_v21 = vrot.slane %v60_v19, 1 }
  0xb4   :  { %v65_v22 = vmul.f32 1.442695, %v63_v20  ;;  %v62_v23 = vmax.f32 %v60_v19, %v61_v21 }
  0xb6   :  { %129 = vpow2.f32 %v65_v22  ;;  %v64_v24 = vsub.f32 %v50_v11, %v62_v23 }
  0xb8   :  { %v67_v25 = vmul.f32 1.442695, %v64_v24 }
  0xba   :  { %131 = vpow2.f32 %v67_v25 }
  0xc0   :  { %v130_v26 = vpop.eup %129 }
  0xc1   :  { %v85_v27 = vrot.slane %v130_v26, 4  ;;  %v69_v28 = vmul.f32 %v130_v26, %v26_v0 }
  0xc3   :  { %v71_v29 = vsel %vm44_vm0, %v69_v28, 0.0  ;;  %v86_v30 = vadd.f32 %v130_v26, %v85_v27 }
  0xc4   :  { %v132_v31 = vpop.eup %131  ;;  %v72_v32 = vrot.slane %v71_v29, 4 }
  0xc5   :  { %v91_v33 = vrot.slane %v132_v31, 4  ;;  %v70_v34 = vmul.f32 %v132_v31, %v27_v2  ;;  %v87_v35 = vrot.slane %v86_v30, 2 }
  0xc6   :  { %v73_v36 = vadd.f32 %v72_v32, %v71_v29 }
  0xc7   :  { %v92_v37 = vadd.f32 %v132_v31, %v91_v33  ;;  %v78_v38 = vsel %vm44_vm0, %v70_v34, 0.0  ;;  %v88_v39 = vadd.f32 %v87_v35, %v86_v30 }
  0xc8   :  { %v79_v40 = vrot.slane %v78_v38, 4  ;;  %v74_v43 = vrot.slane %v73_v36, 2 }
  0xc9   :  { %v89_v41 = vrot.slane %v88_v39, 1  ;;  %v93_v42 = vrot.slane %v92_v37, 2 }
  0xca   :  { %v80_v44 = vadd.f32 %v79_v40, %v78_v38  ;;  %v75_v48 = vadd.f32 %v74_v43, %v73_v36 }
  0xcb   :  { %v90_v45 = vadd.f32 %v89_v41, %v88_v39  ;;  %v94_v46 = vadd.f32 %v93_v42, %v92_v37 }
  0xcc   :  { %v81_v49 = vrot.slane %v80_v44, 2  ;;  %v76_v51 = vrot.slane %v75_v48, 1 }
  0xcd   :  { %v95_v47 = vrot.slane %v94_v46, 1  ;;  %133 = vrcp.f32 %v90_v45 }
  0xce   :  { %v82_v52 = vadd.f32 %v81_v49, %v80_v44  ;;  %v77_v53 = vadd.f32 %v76_v51, %v75_v48 }
  0xcf   :  { %v96_v50 = vadd.f32 %v95_v47, %v94_v46 }
  0xd0   :  { %v83_v54 = vrot.slane %v82_v52, 1 }
  0xd1   :  { %135 = vrcp.f32 %v96_v50 }
  0xd2   :  { %v84_v57 = vadd.f32 %v83_v54, %v82_v52 }
  0xd7   :  { %v134_v55 = vpop.eup %133 }
  0xd8   :  { %v99_v56 = vmul.f32 %v134_v55, %v77_v53 }
  0xda   :  { %102 = vst.msk [vmem:[#allocation5] sm:$0x1] %vm101_vm1, %v99_v56 }
  0xdb   :  { %v136_v58 = vpop.eup %135 }
  0xdc   :  { %v100_v59 = vmul.f32 %v136_v58, %v84_v57 }
  0xde   :  { %103 = vst.msk [vmem:[#allocation5 + $0x1] sm:$0x1] %vm101_vm1, %v100_v59 }
  0xdf   :  { %170 = shalt.err (!%p167_p12)
}
  0xe0   :  { %s171_s30 = scalar_lea.hbm %s242_s2, 32 }
  0xe1   :  { %p172_p13 = scmp.ne.s32.totalorder %s242_s2, %s171_s30  ;;  %p175_p0 = scmp.lt.u32.totalorder %s171_s30, %s242_s2 }
  0xe3   :  { %p177_p1 = pnand %p175_p0, %p172_p13 }
  0xe5   :  { %180 = shalt.err (!%p177_p1)
}
  0xe6   :  { %s189_s7 = smov 16   ;;  %s190_s8 = smov 1  }
  0xe7   :  { %115 = dma.vmem_to_hbm [thread:$0]  %s110_s1, 32, %s242_s2, [#allocation4], %s189_s7, %s189_s7, %s190_s8  }
  0xe8   :  { %183 = dma.done.wait [#allocation4], 32  }
  0xe9   :  { %184 = vsyncadd [#allocation4], 4294967264 }
  0xea   :  { %119 = vsyncpa [#allocation3], 1 }
  0xeb   :  { %120 = vsyncpa [#allocation4], 1 }

</bundles_post_ra>
